<compile_context>
chip_gen: v7x
topology: tpu7x:2x2x1
jax: 0.10.0
libtpu: 0.0.40
codegen_flags: <defaults>
</compile_context>

<pallas_src>
import jax
import jax.numpy as jnp
from jax import lax
from jax.experimental import pallas as pl
from jax.experimental.pallas import tpu as pltpu

N_FEATURES = 32  # GraphConvolutionResourceNetwork.n_features


def gcrn_kernel(bm2_ref,          # SMEM (1,)
                state_ref,        # (tb*R, Fin)   streamed per grid step
                embp_ref,         # (tb*R, F)     batch-invariant tile of emb@W1_emb + b1
                a_t_ref,          # (R, E_pad)    batch-invariant rownorm(exp(-s*D))^T
                w1s_ref,          # (Fin, F)
                w2_ref, b2_ref,   # (F, F), (1, F)
                wm1t_ref,         # (F, F)   Wm1^T
                bm1c_ref,         # (F, 1)   bm1^T
                wm2r_ref,         # (1, F)   Wm2^T
                q_ref,            # out (tb, E_pad)  lane-dense
                h2_sc):           # VMEM scratch (tb*R, F)
    tb = q_ref.shape[0]
    n_res = a_t_ref.shape[0]

    # ---- batched front-end: two MXU dots over the whole (tb*R) row block ----
    pre1 = jnp.dot(state_ref[...], w1s_ref[...],
                   preferred_element_type=jnp.float32)                   # (tb*R, F)
    h1 = jnp.maximum(pre1 + embp_ref[...], 0.0)
    h2 = jnp.maximum(
        jnp.dot(h1.astype(w2_ref.dtype), w2_ref[...],
                preferred_element_type=jnp.float32) + b2_ref[...], 0.0)  # (tb*R, F)
    h2_sc[...] = h2.astype(h2_sc.dtype)

    # loop-invariant operands: load / broadcast once (JAX does not CSE these)
    a_t = a_t_ref[...]        # (R, E_pad)  stays resident as the MXU RHS
    wm1t = wm1t_ref[...]      # (F, F)
    bm1c = bm1c_ref[...]      # (F, 1)
    wm2r = wm2r_ref[...]      # (1, F)
    bm2 = bm2_ref[0]

    def tail(b, carry):
        start = b * n_res
        if n_res % 8 == 0:
            start = pl.multiple_of(start, 8)
        h2_b = h2_sc[pl.ds(start, n_res), :]                             # (R, F)
        # xg^T = h2_b^T @ A^T : E_pad is the MXU N/lane dimension (wide).
        xgt = lax.dot_general(h2_b, a_t, (((0,), (0,)), ((), ())),
                              preferred_element_type=jnp.float32)        # (F, E_pad)
        mt = jnp.maximum(
            jnp.dot(wm1t, xgt.astype(wm1t.dtype),
                    preferred_element_type=jnp.float32) + bm1c, 0.0)     # (F, E_pad)
        q_row = jnp.dot(wm2r, mt.astype(wm2r.dtype),
                        preferred_element_type=jnp.float32) + bm2        # (1, E_pad)
        # unmasked lane-dense row store (E_pad % 128 == 0); the whole (tb,E_pad)
        # block is written back to HBM as a single tile by the pipeline.
        q_ref[pl.ds(b, 1), :] = q_row.astype(q_ref.dtype)
        return carry

    lax.fori_loop(0, tb, tail, 0, unroll=True if tb <= 8 else 4)

    # TODO(synk): allow_wait / long_term_q / nn_scaling branches are disabled
    # in this config and not implemented in the kernel.


def _vmem_bytes_estimate(tb, n_res, fin, f, e_pad):
    """Conservative (f32, double-buffered) VMEM footprint per grid step."""
    b = 4
    stream = 2 * (tb * n_res * fin + tb * e_pad) * b                 # in/out blocks
    invar = 2 * (tb * n_res * f + n_res * e_pad
                 + fin * f + 2 * f * f + 4 * f) * b                  # constant-index inputs
    scratch = tb * n_res * f * b                                     # h2 staging
    interm = (3 * tb * n_res * f + 3 * f * e_pad) * b                # live values
    return stream + invar + scratch + interm


def _pick_tb(batch, n_res, fin, f, e_pad, budget_bytes):
    # legal tb: divides B, and (tb == B) or tb % 8 == 0 (sublane rule for the
    # (tb, E_pad) output block and the (tb*R, Fin) input block when tb < B).
    cands = [d for d in range(batch, 0, -1)
             if batch % d == 0 and (d == batch or d % 8 == 0)]
    for d in cands:
        if _vmem_bytes_estimate(d, n_res, fin, f, e_pad) <= budget_bytes:
            return d
    return cands[-1]


def gcrn_forward(state, emb, distances, scaling, params, *, tb=None,
                 compute_dtype=jnp.float32):
    B, n_res, fin = state.shape
    n_edges = distances.shape[0]
    f = N_FEATURES
    w1, b1, w2, b2, wm1, bm1, wm2, bm2 = params
    assert w1.shape[0] == fin + emb.shape[1]

    e_pad = ((n_edges + 127) // 128) * 128        # lane-dense, unmasked stores

    # Budget fits under the smallest default scoped-VMEM limit across
    # generations (v5e 16 MiB); only raise vmem_limit_bytes if unavoidable.
    budget = 12 * 1024 * 1024
    if tb is None:
        tb = _pick_tb(B, n_res, fin, f, e_pad, budget)
    assert B % tb == 0 and (tb == B or tb % 8 == 0), (B, tb)

    est = _vmem_bytes_estimate(tb, n_res, fin, f, e_pad)
    cp_kwargs = dict(dimension_semantics=("parallel",))   # batch axis: megacore-friendly
    if est > 14 * 1024 * 1024:
        # even the smallest legal tb is big: raise the scoped limit, staying
        # below v7x's 64 MiB physical VMEM.
        cp_kwargs["vmem_limit_bytes"] = int(min(est + (4 << 20), 56 * 1024 * 1024))

    f32 = jnp.float32
    cd = compute_dtype

    # -------- batch-invariant precompute (tiny; done once in XLA) ------------
    a = jnp.exp(-scaling.astype(f32)[0] * distances.astype(f32))          # (E, R)
    a = a / jnp.sum(a, axis=1, keepdims=True)                             # exact division
    a_t = jnp.pad(a, ((0, e_pad - n_edges), (0, 0))).T                    # (R, E_pad)
    embp = emb.astype(f32) @ w1[fin:].astype(f32) + b1.astype(f32)        # (R, F) incl. b1
    embp_t = jnp.tile(embp, (tb, 1))                                      # (tb*R, F)

    # free metadata reshape; no (B, R, F0) concat or transpose is materialized
    state2d = state.astype(cd).reshape(B * n_res, fin)

    out = pl.pallas_call(
        gcrn_kernel,
        out_shape=jax.ShapeDtypeStruct((B, e_pad), jnp.float32),
        grid=(B // tb,),
        in_specs=[
            pl.BlockSpec(memory_space=pltpu.MemorySpace.SMEM),            # bm2 (1,)
            pl.BlockSpec((tb * n_res, fin), lambda i: (i, 0)),            # state (streamed)
            pl.BlockSpec((tb * n_res, f),   lambda i: (0, 0)),            # embp tiled
            pl.BlockSpec((n_res, e_pad),    lambda i: (0, 0)),            # A^T
            pl.BlockSpec((fin, f),          lambda i: (0, 0)),            # W1_state
            pl.BlockSpec((f, f),            lambda i: (0, 0)),            # W2
            pl.BlockSpec((1, f),            lambda i: (0, 0)),            # b2
            pl.BlockSpec((f, f),            lambda i: (0, 0)),            # Wm1^T
            pl.BlockSpec((f, 1),            lambda i: (0, 0)),            # bm1^T (col)
            pl.BlockSpec((1, f),            lambda i: (0, 0)),            # Wm2^T (row)
        ],
        out_specs=pl.BlockSpec((tb, e_pad), lambda i: (i, 0)),
        scratch_shapes=[pltpu.VMEM((tb * n_res, f), cd)],
        compiler_params=pltpu.CompilerParams(**cp_kwargs),
    )(bm2.reshape(1).astype(f32),
      state2d,
      embp_t.astype(cd),
      a_t.astype(cd),
      w1[:fin].astype(cd),
      w2.astype(cd), b2.astype(f32),
      wm1.T.astype(cd), bm1.T.astype(f32),
      wm2.T.astype(cd))

    return out[:, :n_edges]                      # (B, E) == q.squeeze(-1)


def gcrn_reference(state, emb, distances, scaling, params):
    """Pure-JAX reference mirroring the PyTorch forward()."""
    w1, b1, w2, b2, wm1, bm1, wm2, bm2 = params
    B = state.shape[0]
    res_enc = jnp.concatenate(
        [state.astype(jnp.float32),
         jnp.broadcast_to(emb[None], (B,) + emb.shape)], axis=2)
    h = jnp.maximum(res_enc @ w1 + b1, 0.0)
    h = jnp.maximum(h @ w2 + b2, 0.0)
    A = jnp.exp(-scaling[0] * distances)
    A = A / A.sum(1, keepdims=True)
    x = jnp.einsum('er,brf->bef', A, h)
    m = jnp.maximum(x @ wm1 + bm1, 0.0)
    q = (m @ wm2 + bm2)[..., 0]
    return q


if __name__ == "__main__":
    key = jax.random.PRNGKey(0)
    B, R, E = 2, 8, 12         # batch, n_resources, n_edges
    Fin, Demb = 6, 2           # input features, resource_embeddings
    F0 = Fin + Demb

    ks = jax.random.split(key, 12)
    state = jax.random.normal(ks[0], (B, R, Fin), jnp.float32)
    emb = jax.random.uniform(ks[1], (R, Demb), dtype=jnp.float32)            # uniform_()
    distances = jax.random.uniform(ks[2], (E, R), dtype=jnp.float32) * 3.0   # synthetic buffer
    scaling = jax.random.uniform(ks[3], (1,), dtype=jnp.float32)             # uniform_()

    def lin(k, fan_in, shape):
        bound = 1.0 / (fan_in ** 0.5)
        return jax.random.uniform(k, shape, jnp.float32, -bound, bound)

    w1 = lin(ks[4], F0, (F0, N_FEATURES));                  b1 = lin(ks[5], F0, (1, N_FEATURES))
    w2 = lin(ks[6], N_FEATURES, (N_FEATURES, N_FEATURES));  b2 = lin(ks[7], N_FEATURES, (1, N_FEATURES))
    wm1 = lin(ks[8], N_FEATURES, (N_FEATURES, N_FEATURES)); bm1 = lin(ks[9], N_FEATURES, (1, N_FEATURES))
    wm2 = lin(ks[10], N_FEATURES, (N_FEATURES, 1));         bm2 = lin(ks[11], N_FEATURES, (1, 1))
    params = (w1, b1, w2, b2, wm1, bm1, wm2, bm2)

    q = gcrn_forward(state, emb, distances, scaling, params)
    q = jax.block_until_ready(q)

    q_ref = gcrn_reference(state, emb, distances, scaling, params)
    assert q.shape == (B, E), q.shape
    # exact row-normalization restored -> tolerance tight again
    assert jnp.allclose(q, q_ref, rtol=1e-3, atol=1e-4), (q, q_ref)
    print("KERNEL_OK")
</pallas_src>

<mosaic_0001>
module attributes {stable_mosaic.version = 11 : i64} {
  func.func @gcrn_kernel(%arg0: i32, %arg1: memref<1xf32, #tpu.memory_space<smem>>, %arg2: memref<16x6xf32, #tpu.memory_space<vmem>>, %arg3: memref<16x32xf32, #tpu.memory_space<vmem>>, %arg4: memref<8x128xf32, #tpu.memory_space<vmem>>, %arg5: memref<6x32xf32, #tpu.memory_space<vmem>>, %arg6: memref<32x32xf32, #tpu.memory_space<vmem>>, %arg7: memref<1x32xf32, #tpu.memory_space<vmem>>, %arg8: memref<32x32xf32, #tpu.memory_space<vmem>>, %arg9: memref<32x1xf32, #tpu.memory_space<vmem>>, %arg10: memref<1x32xf32, #tpu.memory_space<vmem>>, %arg11: memref<2x128xf32, #tpu.memory_space<vmem>>, %arg12: memref<16x32xf32, #tpu.memory_space<vmem>>) attributes {dimension_semantics = [#tpu.dimension_semantics<parallel>], iteration_bounds = array<i64: 1>, scalar_prefetch = 0 : i64, scratch_operands = 1 : i64, tpu.core_type = #tpu.core_type<tc>, window_params = [{transform_indices = @transform_0, window_bounds = array<i64: 1>}, {transform_indices = @transform_1, window_bounds = array<i64: 16, 6>}, {pipeline_mode = #tpu.pipeline_mode<synchronous>, transform_indices = @transform_2, window_bounds = array<i64: 16, 32>}, {pipeline_mode = #tpu.pipeline_mode<synchronous>, transform_indices = @transform_3, window_bounds = array<i64: 8, 128>}, {pipeline_mode = #tpu.pipeline_mode<synchronous>, transform_indices = @transform_4, window_bounds = array<i64: 6, 32>}, {pipeline_mode = #tpu.pipeline_mode<synchronous>, transform_indices = @transform_5, window_bounds = array<i64: 32, 32>}, {pipeline_mode = #tpu.pipeline_mode<synchronous>, transform_indices = @transform_6, window_bounds = array<i64: 1, 32>}, {pipeline_mode = #tpu.pipeline_mode<synchronous>, transform_indices = @transform_7, window_bounds = array<i64: 32, 32>}, {pipeline_mode = #tpu.pipeline_mode<synchronous>, transform_indices = @transform_8, window_bounds = array<i64: 32, 1>}, {pipeline_mode = #tpu.pipeline_mode<synchronous>, transform_indices = @transform_9, window_bounds = array<i64: 1, 32>}, {transform_indices = @transform_10, window_bounds = array<i64: 2, 128>}]} {
    %c0 = arith.constant 0 : index
    %c0_0 = arith.constant 0 : index
    %0 = vector.load %arg2[%c0, %c0_0] : memref<16x6xf32, #tpu.memory_space<vmem>>, vector<16x6xf32>
    %c0_1 = arith.constant 0 : index
    %c0_2 = arith.constant 0 : index
    %1 = vector.load %arg5[%c0_1, %c0_2] : memref<6x32xf32, #tpu.memory_space<vmem>>, vector<6x32xf32>
    %cst = arith.constant dense<0.000000e+00> : vector<16x32xf32>
    %2 = tpu.matmul %0, %1, %cst {dimension_numbers = #tpu.dot_dimension_numbers<[1], [0], [0], [1], [0, 0, 1, 1], [], []>} : vector<16x6xf32>, vector<6x32xf32>, vector<16x32xf32> -> vector<16x32xf32>
    %c0_3 = arith.constant 0 : index
    %c0_4 = arith.constant 0 : index
    %3 = vector.load %arg3[%c0_3, %c0_4] : memref<16x32xf32, #tpu.memory_space<vmem>>, vector<16x32xf32>
    %4 = arith.addf %2, %3 : vector<16x32xf32>
    %cst_5 = arith.constant 0.000000e+00 : f32
    %5 = vector.broadcast %cst_5 : f32 to vector<16x32xf32>
    %6 = arith.maximumf %4, %5 : vector<16x32xf32>
    %c0_6 = arith.constant 0 : index
    %c0_7 = arith.constant 0 : index
    %7 = vector.load %arg6[%c0_6, %c0_7] : memref<32x32xf32, #tpu.memory_space<vmem>>, vector<32x32xf32>
    %cst_8 = arith.constant dense<0.000000e+00> : vector<16x32xf32>
    %8 = tpu.matmul %6, %7, %cst_8 {dimension_numbers = #tpu.dot_dimension_numbers<[1], [0], [0], [1], [0, 0, 1, 1], [], []>} : vector<16x32xf32>, vector<32x32xf32>, vector<16x32xf32> -> vector<16x32xf32>
    %c0_9 = arith.constant 0 : index
    %c0_10 = arith.constant 0 : index
    %9 = vector.load %arg7[%c0_9, %c0_10] : memref<1x32xf32, #tpu.memory_space<vmem>>, vector<1x32xf32>
    %10 = vector.broadcast %9 : vector<1x32xf32> to vector<16x32xf32>
    %11 = arith.addf %8, %10 : vector<16x32xf32>
    %cst_11 = arith.constant 0.000000e+00 : f32
    %12 = vector.broadcast %cst_11 : f32 to vector<16x32xf32>
    %13 = arith.maximumf %11, %12 : vector<16x32xf32>
    %c0_12 = arith.constant 0 : index
    %c0_13 = arith.constant 0 : index
    %14 = vector.load %arg12[%c0_12, %c0_13] : memref<16x32xf32, #tpu.memory_space<vmem>>, vector<16x32xf32>
    tpu.vector_store %arg12[%c0_12, %c0_13], %13 {strides = array<i32>} : memref<16x32xf32, #tpu.memory_space<vmem>>, vector<16x32xf32>,
    %c0_14 = arith.constant 0 : index
    %c0_15 = arith.constant 0 : index
    %15 = vector.load %arg4[%c0_14, %c0_15] : memref<8x128xf32, #tpu.memory_space<vmem>>, vector<8x128xf32>
    %c0_16 = arith.constant 0 : index
    %c0_17 = arith.constant 0 : index
    %16 = vector.load %arg8[%c0_16, %c0_17] : memref<32x32xf32, #tpu.memory_space<vmem>>, vector<32x32xf32>
    %c0_18 = arith.constant 0 : index
    %c0_19 = arith.constant 0 : index
    %17 = vector.load %arg9[%c0_18, %c0_19] : memref<32x1xf32, #tpu.memory_space<vmem>>, vector<32x1xf32>
    %c0_20 = arith.constant 0 : index
    %c0_21 = arith.constant 0 : index
    %18 = vector.load %arg10[%c0_20, %c0_21] : memref<1x32xf32, #tpu.memory_space<vmem>>, vector<1x32xf32>
    %c0_22 = arith.constant 0 : index
    %19 = memref.load %arg1[%c0_22] : memref<1xf32, #tpu.memory_space<smem>>
    %c0_i32 = arith.constant 0 : i32
    %c8_i32 = arith.constant 8 : i32
    %20 = arith.muli %c0_i32, %c8_i32 : i32
    %21 = tpu.assume_multiple %20, 8 : i32
    %22 = arith.index_cast %21 : i32 to index
    %c0_23 = arith.constant 0 : index
    %23 = vector.load %arg12[%22, %c0_23] : memref<16x32xf32, #tpu.memory_space<vmem>>, vector<8x32xf32>
    %cst_24 = arith.constant dense<0.000000e+00> : vector<32x128xf32>
    %24 = tpu.matmul %23, %15, %cst_24 {dimension_numbers = #tpu.dot_dimension_numbers<[0], [0], [1], [1], [0, 1, 1, 1], [], []>} : vector<8x32xf32>, vector<8x128xf32>, vector<32x128xf32> -> vector<32x128xf32>
    %cst_25 = arith.constant dense<0.000000e+00> : vector<32x128xf32>
    %25 = tpu.matmul %16, %24, %cst_25 {dimension_numbers = #tpu.dot_dimension_numbers<[1], [0], [0], [1], [0, 0, 1, 1], [], []>} : vector<32x32xf32>, vector<32x128xf32>, vector<32x128xf32> -> vector<32x128xf32>
    %26 = vector.broadcast %17 : vector<32x1xf32> to vector<32x128xf32>
    %27 = arith.addf %25, %26 : vector<32x128xf32>
    %cst_26 = arith.constant 0.000000e+00 : f32
    %28 = vector.broadcast %cst_26 : f32 to vector<32x128xf32>
    %29 = arith.maximumf %27, %28 : vector<32x128xf32>
    %cst_27 = arith.constant dense<0.000000e+00> : vector<1x128xf32>
    %30 = tpu.matmul %18, %29, %cst_27 {dimension_numbers = #tpu.dot_dimension_numbers<[1], [0], [0], [1], [0, 0, 1, 1], [], []>} : vector<1x32xf32>, vector<32x128xf32>, vector<1x128xf32> -> vector<1x128xf32>
    %31 = vector.broadcast %19 : f32 to vector<1x128xf32>
    %32 = arith.addf %30, %31 : vector<1x128xf32>
    %33 = arith.index_cast %c0_i32 : i32 to index
    %c0_28 = arith.constant 0 : index
    %34 = vector.load %arg11[%33, %c0_28] : memref<2x128xf32, #tpu.memory_space<vmem>>, vector<1x128xf32>
    tpu.vector_store %arg11[%33, %c0_28], %32 {strides = array<i32>} : memref<2x128xf32, #tpu.memory_space<vmem>>, vector<1x128xf32>,
    %c1_i32 = arith.constant 1 : i32
    %c8_i32_29 = arith.constant 8 : i32
    %35 = arith.muli %c1_i32, %c8_i32_29 : i32
    %36 = tpu.assume_multiple %35, 8 : i32
    %37 = arith.index_cast %36 : i32 to index
    %c0_30 = arith.constant 0 : index
    %38 = vector.load %arg12[%37, %c0_30] : memref<16x32xf32, #tpu.memory_space<vmem>>, vector<8x32xf32>
    %cst_31 = arith.constant dense<0.000000e+00> : vector<32x128xf32>
    %39 = tpu.matmul %38, %15, %cst_31 {dimension_numbers = #tpu.dot_dimension_numbers<[0], [0], [1], [1], [0, 1, 1, 1], [], []>} : vector<8x32xf32>, vector<8x128xf32>, vector<32x128xf32> -> vector<32x128xf32>
    %cst_32 = arith.constant dense<0.000000e+00> : vector<32x128xf32>
    %40 = tpu.matmul %16, %39, %cst_32 {dimension_numbers = #tpu.dot_dimension_numbers<[1], [0], [0], [1], [0, 0, 1, 1], [], []>} : vector<32x32xf32>, vector<32x128xf32>, vector<32x128xf32> -> vector<32x128xf32>
    %41 = vector.broadcast %17 : vector<32x1xf32> to vector<32x128xf32>
    %42 = arith.addf %40, %41 : vector<32x128xf32>
    %cst_33 = arith.constant 0.000000e+00 : f32
    %43 = vector.broadcast %cst_33 : f32 to vector<32x128xf32>
    %44 = arith.maximumf %42, %43 : vector<32x128xf32>
    %cst_34 = arith.constant dense<0.000000e+00> : vector<1x128xf32>
    %45 = tpu.matmul %18, %44, %cst_34 {dimension_numbers = #tpu.dot_dimension_numbers<[1], [0], [0], [1], [0, 0, 1, 1], [], []>} : vector<1x32xf32>, vector<32x128xf32>, vector<1x128xf32> -> vector<1x128xf32>
    %46 = vector.broadcast %19 : f32 to vector<1x128xf32>
    %47 = arith.addf %45, %46 : vector<1x128xf32>
    %48 = arith.index_cast %c1_i32 : i32 to index
    %c0_35 = arith.constant 0 : index
    %49 = vector.load %arg11[%48, %c0_35] : memref<2x128xf32, #tpu.memory_space<vmem>>, vector<1x128xf32>
    tpu.vector_store %arg11[%48, %c0_35], %47 {strides = array<i32>} : memref<2x128xf32, #tpu.memory_space<vmem>>, vector<1x128xf32>,
    %c2_i32 = arith.constant 2 : i32
    return
  }
  func.func @transform_0(%arg0: i32) -> i32 {
    %c0_i32 = arith.constant 0 : i32
    %c0_i32_0 = arith.constant 0 : i32
    return %c0_i32 : i32
  }
  func.func @transform_1(%arg0: i32) -> (i32, i32) {
    %c0_i32 = arith.constant 0 : i32
    %c0_i32_0 = arith.constant 0 : i32
    return %arg0, %c0_i32 : i32, i32
  }
  func.func @transform_2(%arg0: i32) -> (i32, i32) {
    %c0_i32 = arith.constant 0 : i32
    %c0_i32_0 = arith.constant 0 : i32
    %c0_i32_1 = arith.constant 0 : i32
    return %c0_i32, %c0_i32_0 : i32, i32
  }
  func.func @transform_3(%arg0: i32) -> (i32, i32) {
    %c0_i32 = arith.constant 0 : i32
    %c0_i32_0 = arith.constant 0 : i32
    %c0_i32_1 = arith.constant 0 : i32
    return %c0_i32, %c0_i32_0 : i32, i32
  }
  func.func @transform_4(%arg0: i32) -> (i32, i32) {
    %c0_i32 = arith.constant 0 : i32
    %c0_i32_0 = arith.constant 0 : i32
    %c0_i32_1 = arith.constant 0 : i32
    return %c0_i32, %c0_i32_0 : i32, i32
  }
  func.func @transform_5(%arg0: i32) -> (i32, i32) {
    %c0_i32 = arith.constant 0 : i32
    %c0_i32_0 = arith.constant 0 : i32
    %c0_i32_1 = arith.constant 0 : i32
    return %c0_i32, %c0_i32_0 : i32, i32
  }
  func.func @transform_6(%arg0: i32) -> (i32, i32) {
    %c0_i32 = arith.constant 0 : i32
    %c0_i32_0 = arith.constant 0 : i32
    %c0_i32_1 = arith.constant 0 : i32
    return %c0_i32, %c0_i32_0 : i32, i32
  }
  func.func @transform_7(%arg0: i32) -> (i32, i32) {
    %c0_i32 = arith.constant 0 : i32
    %c0_i32_0 = arith.constant 0 : i32
    %c0_i32_1 = arith.constant 0 : i32
    return %c0_i32, %c0_i32_0 : i32, i32
  }
  func.func @transform_8(%arg0: i32) -> (i32, i32) {
    %c0_i32 = arith.constant 0 : i32
    %c0_i32_0 = arith.constant 0 : i32
    %c0_i32_1 = arith.constant 0 : i32
    return %c0_i32, %c0_i32_0 : i32, i32
  }
  func.func @transform_9(%arg0: i32) -> (i32, i32) {
    %c0_i32 = arith.constant 0 : i32
    %c0_i32_0 = arith.constant 0 : i32
    %c0_i32_1 = arith.constant 0 : i32
    return %c0_i32, %c0_i32_0 : i32, i32
  }
  func.func @transform_10(%arg0: i32) -> (i32, i32) {
    %c0_i32 = arith.constant 0 : i32
    %c0_i32_0 = arith.constant 0 : i32
    return %arg0, %c0_i32 : i32, i32
  }
}

</mosaic_0001>

<bundles_post_ra>
// kernel: tpu_custom_call.1
= control target key start
LH: loop header
LB: loop body
LE: loop exit
PB: predicated region body
PF: predicated region fallthrough
CT: control target
= control target key end

     0   :  { %16 = vsyncpa [#allocation5], 0  ;;  %s1356_s0 = inlined_call_operand.<no memory space> [shape: f32[1], index: 0, kind: input, shape index: {}]   ;;  %s1357_s1 = inlined_call_operand.vmem [shape: f32[16,6], index: 1, kind: input, shape index: {}]   ;;  %s1358_s2 = inlined_call_operand.hbm [shape: f32[16,32], index: 2, kind: input, shape index: {}]   ;;  %s1359_s3 = inlined_call_operand.hbm [shape: f32[8,128], index: 3, kind: input, shape index: {}]   ;;  %s1360_s4 = inlined_call_operand.vmem [shape: f32[6,32], index: 4, kind: input, shape index: {}]   ;;  %s1361_s5 = inlined_call_operand.vmem [shape: f32[32,32], index: 5, kind: input, shape index: {}]   ;;  %s1362_s6 = inlined_call_operand.vmem [shape: f32[1,32], index: 6, kind: input, shape index: {}]   ;;  %s1363_s7 = inlined_call_operand.vmem [shape: f32[32,32], index: 7, kind: input, shape index: {}]   ;;  %s1364_s8 = inlined_call_operand.vmem [shape: f32[32,1], index: 8, kind: input, shape index: {}]   ;;  %s1365_s9 = inlined_call_operand.vmem [shape: f32[1,32], index: 9, kind: input, shape index: {}]   ;;  %s1366_s10 = inlined_call_operand.hbm [shape: f32[2,128], index: 10, kind: output, shape index: {}]  }
   0x1   :  { %17 = vsyncpa [#allocation8], 0 }
   0x2   :  { %18 = vsyncpa [#allocation6], 0  ;;  %s1168_s13 = smov [#allocation4]   ;;  %s1096_s17 = scalar_lea.hbm %s1358_s2, 256 }
   0x3   :  { %s28_s14 = sshll.u32 %s1168_s13, 4  ;;  %p1097_p0 = scmp.ne.s32.totalorder %s1358_s2, %s1096_s17  ;;  %s29_s14 = int_to_ptr.vmem [resolvable:$true] %s28_s14 }
   0x4   :  { %p1100_p1 = scmp.lt.u32.totalorder %s1096_s17, %s1358_s2 }
   0x6   :  { %p1102_p2 = pnand %p1100_p1, %p1097_p0 }
   0x8   :  { %1105 = shalt.err (!%p1102_p2)
}
   0x9   :  { %s1106_s22 = scalar_lea.vmem %s29_s14, 256  ;;  %p1111_p4 = scmp.lt.s32.totalorder %s29_s14, %s29_s14 }
   0xa   :  { %p1107_p3 = scmp.ne.s32.totalorder %s29_s14, %s1106_s22  ;;  %p1112_p5 = scmp.lt.s32.totalorder %s1106_s22, %s1106_s22 }
   0xc   :  { %p1113_p6 = por %p1112_p5, %p1111_p4 }
   0xe   :  { %p1114_p7 = pnand %p1113_p6, %p1107_p3 }
  0x10   :  { %1117 = shalt.err (!%p1114_p7)
}
  0x11   :  { %s1169_s23 = smov 128   ;;  %s1170_s24 = smov 8  }
  0x12   :  { %34 = dma.hbm_to_vmem [thread:$0]  %s1358_s2, 256, %s29_s14, [#allocation5], %s1169_s23, %s1169_s23, %s1170_s24  }
  0x13   :  { %s1171_s27 = smov [#allocation7]   ;;  %s1118_s11 = scalar_lea.hbm %s1359_s3, 128 }
  0x14   :  { %s41_s28 = sshll.u32 %s1171_s27, 4  ;;  %p1119_p8 = scmp.ne.s32.totalorder %s1359_s3, %s1118_s11  ;;  %s42_s28 = int_to_ptr.vmem [resolvable:$true] %s41_s28 }
  0x15   :  { %p1122_p9 = scmp.lt.u32.totalorder %s1118_s11, %s1359_s3 }
  0x17   :  { %p1124_p10 = pnand %p1122_p9, %p1119_p8 }
  0x19   :  { %1127 = shalt.err (!%p1124_p10)
}
  0x1a   :  { %s1128_s17 = scalar_lea.vmem %s42_s28, 128  ;;  %p1133_p12 = scmp.lt.s32.totalorder %s42_s28, %s42_s28 }
  0x1b   :  { %p1129_p11 = scmp.ne.s32.totalorder %s42_s28, %s1128_s17  ;;  %p1134_p13 = scmp.lt.s32.totalorder %s1128_s17, %s1128_s17 }
  0x1d   :  { %p1135_p0 = por %p1134_p13, %p1133_p12 }
  0x1f   :  { %p1136_p1 = pnand %p1135_p0, %p1129_p11 }
  0x21   :  { %1139 = shalt.err (!%p1136_p1)
}
  0x22   :  { %44 = dma.hbm_to_vmem [thread:$0]  %s1359_s3, 128, %s42_s28, [#allocation8]  }
  0x23   :  { %1162 = dma.done.wait [#allocation5], 256  }
  0x24   :  { %1163 = vsyncadd [#allocation5], 4294967040 }
  0x25   :  { %1164 = dma.done.wait [#allocation8], 128  }
  0x26   :  { %1165 = vsyncadd [#allocation8], 4294967168  ;;  %vm75_vm0 = vcmask 1045504   ;;  %vm68_vm1 = vcmask 48128   ;;  %v65_v0 = vld [vmem:[%s1360_s4] sm:$0x3f] }
  0x27   :  { %v63_v1 = vld [vmem:[%s1357_s1] sm:$0xff]  ;;  %v64_v2 = vld [vmem:[%s1357_s1 + $0x8] sm:$0xff]  ;;  %967 = vmatprep.subr.msk.mxu0 %vm75_vm0, %v65_v0  ;;  %v158_v6 = vld [vmem:[%s1361_s5 + $0x10] sm:$0xff]  ;;  %v1172_v10 = vmov 0   ;;  %vm167_vm2 = vcmask 261120   ;;  %vm297_vm3 = vcmask 64512  }
  0x28   :  { %969 = vmatprep.mubr.msk.f32.mxu0 %vm68_vm1, %v63_v1  ;;  %v156_v3 = vld [vmem:[%s1361_s5] sm:$0xff]  ;;  %v157_v4 = vld [vmem:[%s1361_s5 + $0x8] sm:$0xff]  ;;  %968 = vmatpush3.msk.msra.mxu0 %vm75_vm0, %v65_v0  ;;  %v159_v7 = vld [vmem:[%s1361_s5 + $0x18] sm:$0xff]  ;;  %v1173_v46 = vmov 0.0|0.0   ;;  %vm1174_vm4 = vmmov 0   ;;  %v1175_v47 = vmov 0.0  }
  0x29   :  { %v1049_v5 = vpack.c.bf16 %v157_v4, %v156_v3  ;;  %970 = vmatmul.mubr.msk.f32.vlgmr.msra.gmra.mrb[0].mxu0 %vm68_vm1, %v64_v2  ;;  %v1053_v8 = vpack.c.bf16 %v159_v7, %v158_v6  ;;  %v259_v9 = vld [vmem:[%s1364_s8 + $0x8] sm:$0xff]  ;;  %1095 = vset.pattern.permute.xlu1 %v1172_v10  ;;  %v260_v11 = vld [vmem:[%s1364_s8 + $0x10] sm:$0xff]  ;;  %v261_v12 = vld [vmem:[%s1364_s8 + $0x18] sm:$0xff]  ;;  %v516_v7 = vstv %s1356_s0  ;;  %s1176_s0 = smov [#allocation9]  }
  0x2a   :  { %402 = vperm.xlu1 %1095, %v259_v9   ;;  %v67_v13 = vld [vmem:[#allocation4 + $0x8] sm:$0xff]  ;;  %v66_v14 = vld [vmem:[#allocation4] sm:$0xff]  ;;  %v901_v21 = vld [vmem:[%s1362_s6] ss:$0 sm:$0xff]  ;;  %s888_s24 = sshll.u32 %s1176_s0, 4  ;;  %s889_s24 = int_to_ptr.vmem [resolvable:$true] %s888_s24 }
  0x2b   :  { %1050 = vmatprep.subr.bf16.mxu1 %v1049_v5  ;;  %v1293_v30 = vld [vmem:[#allocation7] sm:$0xff]  ;;  %v255_v43 = vld [vmem:[%s1363_s7 + $0x8] sm:$0xff]  ;;  %v256_v44 = vld [vmem:[%s1363_s7 + $0x10] sm:$0xff]  ;;  %s1140_s25 = scalar_lea.vmem %s889_s24, 32  ;;  %p1145_p3 = scmp.lt.s32.totalorder %s889_s24, %s889_s24 }
  0x2c   :  { %1052 = vmatpush3.bf16.msra.mxu1 %v1049_v5  ;;  %983 = vmatprep.subr.mxu0 %v1293_v30  ;;  %v254_v35 = vld [vmem:[%s1363_s7] sm:$0xff]  ;;  %v257_v45 = vld [vmem:[%s1363_s7 + $0x18] sm:$0xff]  ;;  %p1141_p2 = scmp.ne.s32.totalorder %s889_s24, %s1140_s25  ;;  %p1146_p4 = scmp.lt.s32.totalorder %s1140_s25, %s1140_s25 }
  0x2d   :  { %1054 = vmatprep.subr.bf16.mxu1 %v1053_v8  ;;  %984 = vmatpush3.msra.mxu0 %v1293_v30  ;;  %v258_v36 = vld [vmem:[%s1364_s8] sm:$0xff] }
  0x2e   :  { %407 = vperm.xlu1 %1095, %v260_v11   ;;  %v262_v4 = vld [vmem:[%s1365_s9] sm:$0x1]  ;;  %p1147_p5 = por %p1146_p4, %p1145_p3 }
  0x30   :  { %1056 = vmatpush3.bf16.msra.mxu1 %v1053_v8  ;;  %p1148_p6 = pnand %p1147_p5, %p1141_p2 }
  0x31   :  { %1065 = vmatprep.subr.bf16.mxu1 %v1173_v46 }
  0x32   :  { %412 = vperm.xlu1 %1095, %v261_v12  }
  0xa9   :  { %v403_v48 = vpop.permute.xlu1 %402 }
  0xad   :  { %v408_v49 = vpop.permute.xlu1 %407 }
  0xb1   :  { %v413_v50 = vpop.permute.xlu1 %412 }
  0xfc   :  { %v971_v15 = vpop.f32.mrb[0].mxu0 }
  0xfd   :  { %v151_v16 = vadd.f32 %v971_v15, %v67_v13  ;;  %v145_v17 = vpop.f32.mrb[1].mxu0 }
  0xfe   :  { %v146_v18 = vadd.f32 %v145_v17, %v66_v14 }
  0xff   :  { %v155_v20 = vmax.f32 %v151_v16, 0.0 }
 0x100   :  { %v154_v19 = vmax.f32 %v146_v18, 0.0 }
 0x102   :  { %980 = vmatprep.mubr.msk.f32.mxu1 %vm167_vm2, %v154_v19 }
 0x103   :  { %981 = vmatmul.mubr.msk.f32.vlgmr.msra.gmra.mrb[0].mxu1 %vm167_vm2, %v155_v20 }
 0x104   :  { %1013 = vmatprep.mubr.msk.f32.mxu1 %vm1174_vm4, %v1175_v47 }
 0x1d6   :  { %v982_v22 = vpop.f32.mrb[0].mxu1 }
 0x1d7   :  { %v246_v23 = vadd.f32 %v982_v22, %v901_v21  ;;  %v240_v24 = vpop.f32.mrb[1].mxu1 }
 0x1d8   :  { %v241_v25 = vadd.f32 %v901_v21, %v240_v24 }
 0x1d9   :  { %v250_v26 = vmax.f32 %v246_v23, 0.0 }
 0x1da   :  { %v249_v27 = vmax.f32 %v241_v25, 0.0 }
 0x1db   :  { %252 = vst.msk [vmem:[#allocation2 + $0x8] sm:$0xff] %vm167_vm2, %v250_v26 }
 0x1dc   :  { %251 = vst.msk [vmem:[#allocation2] sm:$0xff] %vm167_vm2, %v249_v27 }
 0x1e2   :  { %v592_v28 = vld [vmem:[#allocation2 + $0x8] sm:$0xff] }
 0x1e3   :  { %593 = vxpose.xlu1.b32.start.end [1/1] (short) (narrow) %v592_v28, 32  ;;  %v264_v29 = vld [vmem:[#allocation2] sm:$0xff] }
 0x1e4   :  { %265 = vxpose.xlu0.b32.start.end [1/1] (short) (narrow) %v264_v29, 32 }
 0x20d   :  { %1094 = vset.pattern.permute.xlu0 %v1172_v10 }
 0x219   :  { %397 = vperm.xlu0 %1094, %v258_v36  }
 0x263   :  { %v609_v56 = vpop.trf.xlu1 }
 0x264   :  { %v281_v31 = vpop.trf.xlu0 }
 0x265   :  { %985 = vmatprep.mubr.msk.f32.mxu0 %vm297_vm3, %v281_v31 }
 0x267   :  { %v610_v2 = vpop.trf.xlu1 }
 0x268   :  { %v282_v32 = vpop.trf.xlu0 }
 0x269   :  { %986 = vmatmul.mubr.msk.f32.vlgmr.msra.gmra.mrb[2].mxu0 %vm297_vm3, %v282_v32 }
 0x26b   :  { %v611_v5 = vpop.trf.xlu1 }
 0x26c   :  { %v283_v33 = vpop.trf.xlu0 }
 0x26d   :  { %988 = vmatprep.mubr.msk.f32.mxu0 %vm297_vm3, %v283_v33 }
 0x26f   :  { %v612_v6 = vpop.trf.xlu1 }
 0x270   :  { %v284_v34 = vpop.trf.xlu0 }
 0x271   :  { %989 = vmatmul.mubr.msk.f32.gmra.mrb[4].mxu0 %vm297_vm3, %v284_v34 }
 0x272   :  { %999 = vmatprep.mubr.msk.f32.mxu0 %vm167_vm2, %v254_v35 }
 0x298   :  { %v398_v51 = vpop.permute.xlu0 %397 }
 0x33c   :  { %v987_v37 = vpop.f32.mrb[2].mxu0 }
 0x33d   :  { %v376_v38 = vpop.f32.mrb[3].mxu0 }
 0x33e   :  { %v1057_v39 = vpack.c.bf16 %v987_v37, %v376_v38 }
 0x340   :  { %1058 = vmatprep.subr.bf16.mxu0 %v1057_v39 }
 0x341   :  { %1060 = vmatpush3.bf16.msra.mxu0 %v1057_v39 }
 0x344   :  { %v990_v40 = vpop.f32.mrb[4].mxu0 }
 0x345   :  { %v386_v41 = vpop.f32.mrb[5].mxu0 }
 0x346   :  { %v1061_v42 = vpack.c.bf16 %v990_v40, %v386_v41 }
 0x348   :  { %1062 = vmatprep.subr.bf16.mxu0 %v1061_v42 }
 0x349   :  { %1064 = vmatpush3.bf16.msra.mxu0 %v1061_v42 }
 0x34c   :  { %1000 = vmatmul.mubr.msk.f32.vlgmr.msra.gmra.mrb[6].mxu0 %vm167_vm2, %v255_v43 }
 0x34d   :  { %1002 = vmatprep.mubr.msk.f32.mxu0 %vm167_vm2, %v256_v44 }
 0x350   :  { %1003 = vmatmul.mubr.msk.f32.gmra.mrb[8].mxu0 %vm167_vm2, %v257_v45 }
 0x351   :  { %1032 = vmatprep.mubr.msk.f32.mxu0 %vm167_vm2, %v254_v35 }
 0x41f   :  { %v1001_v52 = vpop.f32.mrb[6].mxu0 }
 0x420   :  { %v499_v53 = vadd.f32 %v1001_v52, %v403_v48  ;;  %v493_v54 = vpop.f32.mrb[7].mxu0 }
 0x421   :  { %v494_v55 = vadd.f32 %v493_v54, %v398_v51 }
 0x422   :  { %v513_v57 = vmax.f32 %v499_v53, 0.0 }
 0x423   :  { %v512_v58 = vmax.f32 %v494_v55, 0.0  ;;  %v1004_v59 = vpop.f32.mrb[8].mxu0 }
 0x424   :  { %v509_v60 = vadd.f32 %v1004_v59, %v413_v50  ;;  %v503_v61 = vpop.f32.mrb[9].mxu0 }
 0x425   :  { %v1066_v62 = vpack.c.bf16 %v513_v57, %v512_v58  ;;  %v504_v63 = vadd.f32 %v503_v61, %v408_v49 }
 0x426   :  { %v515_v0 = vmax.f32 %v509_v60, 0.0 }
 0x427   :  { %v514_v1 = vmax.f32 %v504_v63, 0.0  ;;  %1067 = vmatpush3.bf16.msra.mxu1 %v1066_v62 }
 0x428   :  { %1068 = vmatprep.subr.bf16.mxu1 %v1173_v46 }
 0x429   :  { %v1069_v3 = vpack.c.bf16 %v515_v0, %v514_v1 }
 0x42b   :  { %1070 = vmatpush3.bf16.msra.mxu1 %v1069_v3 }
 0x42c   :  { %1016 = vmatprep.subr.mxu1 %v1293_v30 }
 0x42e   :  { %1014 = vmatmul.mubr.msk.f32.vlgmr.msra.gmra.mrb[2].mxu1 %vm167_vm2, %v262_v4 }
 0x42f   :  { %1017 = vmatpush3.msra.mxu1 %v1293_v30  ;;  %1018 = vmatprep.mubr.msk.f32.mxu1 %vm297_vm3, %v609_v56 }
 0x430   :  { %1079 = vmatprep.subr.bf16.mxu1 %v1173_v46 }
 0x432   :  { %1019 = vmatmul.mubr.msk.f32.vlgmr.msra.gmra.mrb[4].mxu1 %vm297_vm3, %v610_v2 }
 0x433   :  { %1021 = vmatprep.mubr.msk.f32.mxu1 %vm297_vm3, %v611_v5 }
 0x436   :  { %1022 = vmatmul.mubr.msk.f32.gmra.mrb[6].mxu1 %vm297_vm3, %v612_v6 }
 0x437   :  { %1046 = vmatprep.mubr.msk.f32.mxu1 %vm1174_vm4, %v1175_v47 }
 0x501   :  { %v586_v8 = vpop.f32.mrb[2].mxu1 }
 0x502   :  { %v587_v9 = vadd.f32 %v586_v8, %v516_v7  ;;  %v1015_v10 = vpop.f32.mrb[3].mxu1 }
 0x504   :  { %590 = vst [vmem:[#allocation9] sm:$0x1] %v587_v9 }
 0x505   :  { %v1020_v11 = vpop.f32.mrb[4].mxu1 }
 0x506   :  { %v703_v12 = vpop.f32.mrb[5].mxu1 }
 0x507   :  { %v1071_v13 = vpack.c.bf16 %v1020_v11, %v703_v12 }
 0x509   :  { %v1023_v14 = vpop.f32.mrb[6].mxu1  ;;  %1072 = vmatprep.subr.bf16.mxu0 %v1071_v13 }
 0x50a   :  { %v713_v15 = vpop.f32.mrb[7].mxu1  ;;  %1074 = vmatpush3.bf16.msra.mxu0 %v1071_v13 }
 0x50b   :  { %v1075_v16 = vpack.c.bf16 %v1023_v14, %v713_v15 }
 0x50d   :  { %1076 = vmatprep.subr.bf16.mxu0 %v1075_v16 }
 0x50e   :  { %1078 = vmatpush3.bf16.msra.mxu0 %v1075_v16 }
 0x511   :  { %1033 = vmatmul.mubr.msk.f32.vlgmr.msra.gmra.mrb[10].mxu0 %vm167_vm2, %v255_v43 }
 0x512   :  { %1035 = vmatprep.mubr.msk.f32.mxu0 %vm167_vm2, %v256_v44 }
 0x515   :  { %1036 = vmatmul.mubr.msk.f32.gmra.mrb[12].mxu0 %vm167_vm2, %v257_v45 }
 0x5e4   :  { %v1034_v17 = vpop.f32.mrb[10].mxu0 }
 0x5e5   :  { %v794_v18 = vadd.f32 %v1034_v17, %v403_v48  ;;  %v788_v19 = vpop.f32.mrb[11].mxu0 }
 0x5e6   :  { %v789_v20 = vadd.f32 %v788_v19, %v398_v51 }
 0x5e7   :  { %v808_v21 = vmax.f32 %v794_v18, 0.0 }
 0x5e8   :  { %v807_v22 = vmax.f32 %v789_v20, 0.0  ;;  %v1037_v23 = vpop.f32.mrb[12].mxu0 }
 0x5e9   :  { %v804_v24 = vadd.f32 %v1037_v23, %v413_v50  ;;  %v798_v25 = vpop.f32.mrb[13].mxu0 }
 0x5ea   :  { %v1080_v26 = vpack.c.bf16 %v808_v21, %v807_v22  ;;  %v799_v27 = vadd.f32 %v798_v25, %v408_v49 }
 0x5eb   :  { %v810_v28 = vmax.f32 %v804_v24, 0.0 }
 0x5ec   :  { %v809_v29 = vmax.f32 %v799_v27, 0.0  ;;  %1081 = vmatpush3.bf16.msra.mxu1 %v1080_v26 }
 0x5ed   :  { %1082 = vmatprep.subr.bf16.mxu1 %v1173_v46 }
 0x5ee   :  { %v1083_v30 = vpack.c.bf16 %v810_v28, %v809_v29 }
 0x5f0   :  { %1084 = vmatpush3.bf16.msra.mxu1 %v1083_v30 }
 0x5f3   :  { %1047 = vmatmul.mubr.msk.f32.vlgmr.msra.gmra.mrb[8].mxu1 %vm167_vm2, %v262_v4 }
 0x6c6   :  { %v877_v31 = vpop.f32.mrb[8].mxu1 }
 0x6c7   :  { %v878_v32 = vadd.f32 %v877_v31, %v516_v7  ;;  %v1048_v33 = vpop.f32.mrb[9].mxu1 }
 0x6c9   :  { %881 = vst [vmem:[#allocation9 + $0x1] sm:$0x1] %v878_v32 }
 0x6ca   :  { %1151 = shalt.err (!%p1148_p6)
}
 0x6cb   :  { %s1152_s27 = scalar_lea.hbm %s1366_s10, 32 }
 0x6cc   :  { %p1153_p7 = scmp.ne.s32.totalorder %s1366_s10, %s1152_s27  ;;  %p1156_p8 = scmp.lt.u32.totalorder %s1152_s27, %s1366_s10 }
 0x6ce   :  { %p1158_p9 = pnand %p1156_p8, %p1153_p7 }
 0x6d0   :  { %1161 = shalt.err (!%p1158_p9)
}
 0x6d1   :  { %891 = dma.vmem_to_hbm [thread:$0]  %s889_s24, 32, %s1366_s10, [#allocation6]  }
 0x6d2   :  { %1166 = dma.done.wait [#allocation6], 32  }
 0x6d3   :  { %1167 = vsyncadd [#allocation6], 4294967264 }
 0x6d4   :  { %895 = vsyncpa [#allocation5], 1 }
 0x6d5   :  { %896 = vsyncpa [#allocation8], 1 }
 0x6d6   :  { %897 = vsyncpa [#allocation6], 1 }

</bundles_post_ra>
